<compile_context>
chip_gen: v7x
topology: tpu7x:2x2x1
jax: 0.10.0
libtpu: 0.0.40
codegen_flags: <defaults>
</compile_context>

<pallas_src>
import numpy as np
import jax
import jax.numpy as jnp
from jax.experimental import pallas as pl
from jax.experimental.pallas import tpu as pltpu


# ---------------------------------------------------------------------------
# Fused Pallas kernel: all SAGE layers + ReLU + masked mean-pool for one
# block-diagonal tile of packed graphs.
# ---------------------------------------------------------------------------
def _make_fused_graphsage_kernel(n_layers):
    def kernel(a_ref, x_ref, pool_ref, *rest):
        # rest = (W_l1, W_r1, b1, ..., W_lL, W_rL, bL, o_ref)
        o_ref = rest[-1]
        w_refs = rest[:-1]

        A = a_ref[...]                 # [Nt, Nt] bf16 block-diag row-normalized adjacency
        h = x_ref[...]                 # [Nt, C_in] f32 packed node features

        def layer_params(i):
            return (w_refs[3 * i][...], w_refs[3 * i + 1][...],
                    w_refs[3 * i + 2][...])

        for i in range(n_layers - 1):
            w_l, w_r, b = layer_params(i)
            # mean aggregation over incoming neighbors: bf16 MXU dot, f32 acc
            agg = jnp.dot(A, h.astype(A.dtype),
                          preferred_element_type=jnp.float32)
            # SAGEConv = lin_l(agg) + lin_r(h): two accumulating dots, no concat
            h = (jnp.dot(agg, w_l, preferred_element_type=jnp.float32)
                 + jnp.dot(h, w_r, preferred_element_type=jnp.float32) + b)
            # ReLU between layers; dropout = identity in eval mode.
            # NOTE: padding rows become ReLU(b) here; harmless because the
            # padded A columns are zero and the pool matrix zeroes those rows.
            h = jnp.maximum(h, 0.0)

        # Last layer: pool BEFORE the linear (exact: no ReLU after the last
        # conv and every pool row sums to 1), so the final matmul is
        # [Gt, C] x [C, D] instead of [Nt, C] x [C, D].
        w_l, w_r, b = layer_params(n_layers - 1)
        agg = jnp.dot(A, h.astype(A.dtype), preferred_element_type=jnp.float32)
        pw = pool_ref[...]             # [Gt, Nt]; row g = 1/n_g over graph g's rows
        p_agg = jnp.dot(pw, agg, preferred_element_type=jnp.float32)   # [Gt, C]
        p_h = jnp.dot(pw, h, preferred_element_type=jnp.float32)       # [Gt, C]
        o_ref[...] = (jnp.dot(p_agg, w_l, preferred_element_type=jnp.float32)
                      + jnp.dot(p_h, w_r, preferred_element_type=jnp.float32)
                      + b).astype(o_ref.dtype)

    return kernel


def graphsage_forward_packed(params, A_tiles, x_tiles, pool_tiles):
    """Run the fused GNN over packed block-diagonal tiles.

    A_tiles    [T, Nt, Nt]  bf16 block-diagonal row-normalized adjacency
    x_tiles    [T, Nt, C]   f32 packed node features
    pool_tiles [T, Gt, Nt]  f32 per-graph mean-pool weights (rows sum to 1)
    returns    [T * Gt, D]  pooled graph embeddings (padding slots included)
    """
    T, Nt, _ = A_tiles.shape
    Gt = pool_tiles.shape[1]
    C = x_tiles.shape[2]
    D = int(params[-1][0].shape[1])
    n_layers = len(params)

    in_specs = [
        # TODO(synk): on v5e, if the A DMA is still exposed, add
        # pipeline_mode=pl.Buffered(3) to this spec for deeper prefetch.
        pl.BlockSpec((None, Nt, Nt), lambda t: (t, 0, 0)),   # A (bf16)
        pl.BlockSpec((None, Nt, C), lambda t: (t, 0, 0)),    # x
        pl.BlockSpec((None, Gt, Nt), lambda t: (t, 0, 0)),   # pool matrix
    ]
    flat_weights = []
    for (w_l, w_r, b) in params:
        for w in (w_l, w_r, b):
            in_specs.append(pl.BlockSpec(tuple(w.shape), lambda t: (0, 0)))
            flat_weights.append(w)

    # Explicit VMEM budget: double-buffered tiles + resident weights, with
    # headroom for the in-kernel h/agg temporaries.  Capped at 56 MiB so the
    # same setting is also valid on v7x (64 MiB physical VMEM).
    a_bytes = Nt * Nt * A_tiles.dtype.itemsize
    x_bytes = Nt * C * x_tiles.dtype.itemsize
    p_bytes = Gt * Nt * pool_tiles.dtype.itemsize
    o_bytes = Gt * D * 4
    w_bytes = sum(int(np.prod(w.shape)) * w.dtype.itemsize for w in flat_weights)
    needed = 2 * (a_bytes + x_bytes + p_bytes + o_bytes) + w_bytes
    vmem_limit_bytes = int(min(56 << 20, max(16 << 20, 4 * needed)))

    out = pl.pallas_call(
        _make_fused_graphsage_kernel(n_layers),
        out_shape=jax.ShapeDtypeStruct((T, Gt, D), jnp.float32),
        grid=(T,),
        in_specs=in_specs,
        out_specs=pl.BlockSpec((None, Gt, D), lambda t: (t, 0, 0)),
        compiler_params=pltpu.CompilerParams(
            dimension_semantics=("parallel",),   # tiles split across TCs (v7x)
            vmem_limit_bytes=vmem_limit_bytes),
    )(A_tiles, x_tiles, pool_tiles, *flat_weights)
    return out.reshape(T * Gt, D)


# ---------------------------------------------------------------------------
# Host-side glue (numpy): adjacency construction + block-diagonal packing.
# ---------------------------------------------------------------------------
def _mean_adjacency(edge_index, num_nodes):
    """Dense row-normalized adjacency: A[i, j] = 1/deg_in(i) for edge j -> i."""
    src = np.asarray(edge_index[0], np.int64)
    dst = np.asarray(edge_index[1], np.int64)
    a = np.zeros((num_nodes, num_nodes), np.float32)
    np.add.at(a, (dst, src), 1.0)
    deg = a.sum(axis=1, keepdims=True)
    return np.where(deg > 0, a / np.maximum(deg, 1.0), 0.0)


def pack_graphs(node_features_list, edge_index_list, tile_nodes=128):
    """Pack many small graphs into [T, tile_nodes, *] block-diagonal tiles.

    tile_nodes should be a multiple of 128 (prefer 256 on v6e/v7x if VMEM
    allows) so the A @ h contraction and the lane axis are tile-aligned.
    Returns (A_tiles bf16, x_tiles f32, pool_tiles f32, graph_rows i32, Gt).
    """
    feats = [np.asarray(x, np.float32) for x in node_features_list]
    sizes = [int(f.shape[0]) for f in feats]
    C = int(feats[0].shape[1])
    # TODO(synk): graphs with > tile_nodes nodes need an extra 'arbitrary'
    # reduction grid axis over A's source-node columns (or an edge-list
    # segment-mean via PrefetchScalarGridSpec); dense per-tile f32 A stops
    # fitting v7x's 64 MiB VMEM around Nt ~ 2K even with bf16.
    assert max(sizes) <= tile_nodes, "graph larger than one packing tile"

    # Greedy first-fit packing of graphs into tiles of <= tile_nodes rows.
    tiles, cur, cur_n = [], [], 0
    for g, n in enumerate(sizes):
        if cur_n + n > tile_nodes:
            tiles.append(cur)
            cur, cur_n = [], 0
        cur.append(g)
        cur_n += n
    if cur:
        tiles.append(cur)

    g_per_tile = max(len(t) for t in tiles)
    gt = max(8, -(-g_per_tile // 8) * 8)          # sublane-aligned graph slots
    T = len(tiles)

    A = np.zeros((T, tile_nodes, tile_nodes), np.float32)
    X = np.zeros((T, tile_nodes, C), np.float32)
    PW = np.zeros((T, gt, tile_nodes), np.float32)
    rows = np.zeros((len(sizes),), np.int32)

    for t_idx, graph_ids in enumerate(tiles):
        off = 0
        for slot, g in enumerate(graph_ids):
            n = sizes[g]
            A[t_idx, off:off + n, off:off + n] = _mean_adjacency(
                edge_index_list[g], n)
            X[t_idx, off:off + n, :] = feats[g]
            PW[t_idx, slot, off:off + n] = 1.0 / float(n)   # masked mean pool
            rows[g] = t_idx * gt + slot
            off += n

    return (jnp.asarray(A, jnp.bfloat16),   # bf16 A: halves HBM/VMEM traffic
            jnp.asarray(X, jnp.float32),
            jnp.asarray(PW, jnp.float32),
            jnp.asarray(rows, jnp.int32),
            gt)


def init_params(key, in_channels, hidden_channels, out_channels, n_layers):
    """Per SAGE layer: (W_l [cin,cout], W_r [cin,cout], b_l [1,cout]).
    Weights stored transposed vs torch nn.Linear (y = x @ W + b) and
    re-initialized with normal(0, 1) like the module's init loop."""
    if n_layers > 1:
        dims = ([(in_channels, hidden_channels)]
                + [(hidden_channels, hidden_channels)] * (n_layers - 2)
                + [(hidden_channels, out_channels)])
    else:
        dims = [(in_channels, out_channels)]
    params = []
    for cin, cout in dims:
        key, k1, k2 = jax.random.split(key, 3)
        w_l = jax.random.normal(k1, (cin, cout), jnp.float32)   # lin_l (on agg)
        w_r = jax.random.normal(k2, (cin, cout), jnp.float32)   # lin_r (on self)
        b_l = jnp.zeros((1, cout), jnp.float32)                 # lin_r has no bias
        params.append((w_l, w_r, b_l))
    # fc1 / fc2 (projection head) are not used in forward(); omitted.
    return params


def graphsage_encoder_forward(params, embed_tokens, input_ids, is_node,
                              node_features_list, edge_index_list,
                              tile_nodes=128):
    # Per-graph GNN encodings (GT(...)[0]) — one fused pallas_call over all
    # block-diagonal packed tiles.
    A_t, x_t, pw_t, graph_rows, _ = pack_graphs(
        node_features_list, edge_index_list, tile_nodes=tile_nodes)
    pooled = graphsage_forward_packed(params, A_t, x_t, pw_t)    # [T*Gt, D]
    node_embeddings = jnp.take(pooled, graph_rows, axis=0)       # [G, D]

    # inputs_embeds = embed_tokens[input_ids]; inputs_embeds[is_node] = node_embs
    # (gather + splice stays in plain JAX; XLA fuses the blend).
    # NOTE: like the PyTorch indexed assignment, this assumes exactly one
    # is_node position per graph (in order); the clip only guards the gather.
    tok_emb = jnp.take(embed_tokens, input_ids, axis=0)          # [S, D]
    slot = jnp.clip(jnp.cumsum(is_node.astype(jnp.int32)) - 1,
                    0, node_embeddings.shape[0] - 1)
    node_rows = jnp.take(node_embeddings, slot, axis=0)          # [S, D]
    return jnp.where(is_node[:, None], node_rows, tok_emb)       # [S, D]


# ---------------------------------------------------------------------------
if __name__ == "__main__":
    # small config consistent with the module:
    #   gt_layers=2, gnn_input=16, att_d_model=32, gnn_output=32 (= llama emb dim)
    GNN_INPUT, HIDDEN, OUT = 16, 32, 32
    N_LAYERS = 2
    NUM_GRAPHS, N_NODES, N_EDGES = 2, 8, 12
    SEQ, VOCAB, EMB = 8, 64, OUT

    key = jax.random.PRNGKey(0)
    key, kp, ke = jax.random.split(key, 3)
    params = init_params(kp, GNN_INPUT, HIDDEN, OUT, N_LAYERS)
    embed_tokens = jax.random.normal(ke, (VOCAB, EMB), jnp.float32)

    node_features_list, edge_index_list = [], []
    for _ in range(NUM_GRAPHS):
        key, kx, ks, kd = jax.random.split(key, 4)
        node_features_list.append(
            jax.random.normal(kx, (N_NODES, GNN_INPUT), jnp.float32))
        src = jax.random.randint(ks, (N_EDGES,), 0, N_NODES, jnp.int32)
        dst = jax.random.randint(kd, (N_EDGES,), 0, N_NODES, jnp.int32)
        edge_index_list.append(jnp.stack([src, dst], axis=0))    # [2, E]

    key, ki = jax.random.split(key)
    input_ids = jax.random.randint(ki, (SEQ,), 0, VOCAB, jnp.int32)
    is_node = jnp.zeros((SEQ,), jnp.bool_).at[jnp.array([1, 5])].set(True)

    out = graphsage_encoder_forward(params, embed_tokens, input_ids, is_node,
                                    node_features_list, edge_index_list)
    jax.block_until_ready(out)
    assert out.shape == (SEQ, EMB)
    print("KERNEL_OK")
</pallas_src>

<mosaic_0001>
module attributes {stable_mosaic.version = 11 : i64} {
  func.func @kernel(%arg0: i32, %arg1: memref<1x128x128xbf16, #tpu.memory_space<vmem>>, %arg2: memref<1x128x16xf32, #tpu.memory_space<vmem>>, %arg3: memref<1x8x128xf32, #tpu.memory_space<vmem>>, %arg4: memref<16x32xf32, #tpu.memory_space<vmem>>, %arg5: memref<16x32xf32, #tpu.memory_space<vmem>>, %arg6: memref<1x32xf32, #tpu.memory_space<vmem>>, %arg7: memref<32x32xf32, #tpu.memory_space<vmem>>, %arg8: memref<32x32xf32, #tpu.memory_space<vmem>>, %arg9: memref<1x32xf32, #tpu.memory_space<vmem>>, %arg10: memref<1x8x32xf32, #tpu.memory_space<vmem>>) attributes {dimension_semantics = [#tpu.dimension_semantics<parallel>], iteration_bounds = array<i64: 1>, scalar_prefetch = 0 : i64, scratch_operands = 0 : i64, tpu.core_type = #tpu.core_type<tc>, window_params = [{transform_indices = @transform_0, window_bounds = array<i64: 1, 128, 128>}, {transform_indices = @transform_1, window_bounds = array<i64: 1, 128, 16>}, {transform_indices = @transform_2, window_bounds = array<i64: 1, 8, 128>}, {pipeline_mode = #tpu.pipeline_mode<synchronous>, transform_indices = @transform_3, window_bounds = array<i64: 16, 32>}, {pipeline_mode = #tpu.pipeline_mode<synchronous>, transform_indices = @transform_4, window_bounds = array<i64: 16, 32>}, {pipeline_mode = #tpu.pipeline_mode<synchronous>, transform_indices = @transform_5, window_bounds = array<i64: 1, 32>}, {pipeline_mode = #tpu.pipeline_mode<synchronous>, transform_indices = @transform_6, window_bounds = array<i64: 32, 32>}, {pipeline_mode = #tpu.pipeline_mode<synchronous>, transform_indices = @transform_7, window_bounds = array<i64: 32, 32>}, {pipeline_mode = #tpu.pipeline_mode<synchronous>, transform_indices = @transform_8, window_bounds = array<i64: 1, 32>}, {transform_indices = @transform_9, window_bounds = array<i64: 1, 8, 32>}]} {
    %c0 = arith.constant 0 : index
    %c0_0 = arith.constant 0 : index
    %c0_1 = arith.constant 0 : index
    %0 = vector.load %arg1[%c0, %c0_0, %c0_1] : memref<1x128x128xbf16, #tpu.memory_space<vmem>>, vector<1x128x128xbf16>
    %1 = vector.shape_cast %0 : vector<1x128x128xbf16> to vector<128x128xbf16>
    %c0_2 = arith.constant 0 : index
    %c0_3 = arith.constant 0 : index
    %c0_4 = arith.constant 0 : index
    %2 = vector.load %arg2[%c0_2, %c0_3, %c0_4] : memref<1x128x16xf32, #tpu.memory_space<vmem>>, vector<1x128x16xf32>
    %3 = vector.shape_cast %2 : vector<1x128x16xf32> to vector<128x16xf32>
    %c0_5 = arith.constant 0 : index
    %c0_6 = arith.constant 0 : index
    %4 = vector.load %arg4[%c0_5, %c0_6] : memref<16x32xf32, #tpu.memory_space<vmem>>, vector<16x32xf32>
    %c0_7 = arith.constant 0 : index
    %c0_8 = arith.constant 0 : index
    %5 = vector.load %arg5[%c0_7, %c0_8] : memref<16x32xf32, #tpu.memory_space<vmem>>, vector<16x32xf32>
    %c0_9 = arith.constant 0 : index
    %c0_10 = arith.constant 0 : index
    %6 = vector.load %arg6[%c0_9, %c0_10] : memref<1x32xf32, #tpu.memory_space<vmem>>, vector<1x32xf32>
    %7 = arith.truncf %3 : vector<128x16xf32> to vector<128x16xbf16>
    %cst = arith.constant dense<0.000000e+00> : vector<128x16xf32>
    %8 = tpu.matmul %1, %7, %cst {dimension_numbers = #tpu.dot_dimension_numbers<[1], [0], [0], [1], [0, 0, 1, 1], [], []>} : vector<128x128xbf16>, vector<128x16xbf16>, vector<128x16xf32> -> vector<128x16xf32>
    %cst_11 = arith.constant dense<0.000000e+00> : vector<128x32xf32>
    %9 = tpu.matmul %8, %4, %cst_11 {dimension_numbers = #tpu.dot_dimension_numbers<[1], [0], [0], [1], [0, 0, 1, 1], [], []>} : vector<128x16xf32>, vector<16x32xf32>, vector<128x32xf32> -> vector<128x32xf32>
    %cst_12 = arith.constant dense<0.000000e+00> : vector<128x32xf32>
    %10 = tpu.matmul %3, %5, %cst_12 {dimension_numbers = #tpu.dot_dimension_numbers<[1], [0], [0], [1], [0, 0, 1, 1], [], []>} : vector<128x16xf32>, vector<16x32xf32>, vector<128x32xf32> -> vector<128x32xf32>
    %11 = arith.addf %9, %10 : vector<128x32xf32>
    %12 = vector.broadcast %6 : vector<1x32xf32> to vector<128x32xf32>
    %13 = arith.addf %11, %12 : vector<128x32xf32>
    %cst_13 = arith.constant 0.000000e+00 : f32
    %14 = vector.broadcast %cst_13 : f32 to vector<128x32xf32>
    %15 = arith.maximumf %13, %14 : vector<128x32xf32>
    %c0_14 = arith.constant 0 : index
    %c0_15 = arith.constant 0 : index
    %16 = vector.load %arg7[%c0_14, %c0_15] : memref<32x32xf32, #tpu.memory_space<vmem>>, vector<32x32xf32>
    %c0_16 = arith.constant 0 : index
    %c0_17 = arith.constant 0 : index
    %17 = vector.load %arg8[%c0_16, %c0_17] : memref<32x32xf32, #tpu.memory_space<vmem>>, vector<32x32xf32>
    %c0_18 = arith.constant 0 : index
    %c0_19 = arith.constant 0 : index
    %18 = vector.load %arg9[%c0_18, %c0_19] : memref<1x32xf32, #tpu.memory_space<vmem>>, vector<1x32xf32>
    %19 = arith.truncf %15 : vector<128x32xf32> to vector<128x32xbf16>
    %cst_20 = arith.constant dense<0.000000e+00> : vector<128x32xf32>
    %20 = tpu.matmul %1, %19, %cst_20 {dimension_numbers = #tpu.dot_dimension_numbers<[1], [0], [0], [1], [0, 0, 1, 1], [], []>} : vector<128x128xbf16>, vector<128x32xbf16>, vector<128x32xf32> -> vector<128x32xf32>
    %c0_21 = arith.constant 0 : index
    %c0_22 = arith.constant 0 : index
    %c0_23 = arith.constant 0 : index
    %21 = vector.load %arg3[%c0_21, %c0_22, %c0_23] : memref<1x8x128xf32, #tpu.memory_space<vmem>>, vector<1x8x128xf32>
    %22 = vector.shape_cast %21 : vector<1x8x128xf32> to vector<8x128xf32>
    %cst_24 = arith.constant dense<0.000000e+00> : vector<8x32xf32>
    %23 = tpu.matmul %22, %20, %cst_24 {dimension_numbers = #tpu.dot_dimension_numbers<[1], [0], [0], [1], [0, 0, 1, 1], [], []>} : vector<8x128xf32>, vector<128x32xf32>, vector<8x32xf32> -> vector<8x32xf32>
    %cst_25 = arith.constant dense<0.000000e+00> : vector<8x32xf32>
    %24 = tpu.matmul %22, %15, %cst_25 {dimension_numbers = #tpu.dot_dimension_numbers<[1], [0], [0], [1], [0, 0, 1, 1], [], []>} : vector<8x128xf32>, vector<128x32xf32>, vector<8x32xf32> -> vector<8x32xf32>
    %cst_26 = arith.constant dense<0.000000e+00> : vector<8x32xf32>
    %25 = tpu.matmul %23, %16, %cst_26 {dimension_numbers = #tpu.dot_dimension_numbers<[1], [0], [0], [1], [0, 0, 1, 1], [], []>} : vector<8x32xf32>, vector<32x32xf32>, vector<8x32xf32> -> vector<8x32xf32>
    %cst_27 = arith.constant dense<0.000000e+00> : vector<8x32xf32>
    %26 = tpu.matmul %24, %17, %cst_27 {dimension_numbers = #tpu.dot_dimension_numbers<[1], [0], [0], [1], [0, 0, 1, 1], [], []>} : vector<8x32xf32>, vector<32x32xf32>, vector<8x32xf32> -> vector<8x32xf32>
    %27 = arith.addf %25, %26 : vector<8x32xf32>
    %28 = vector.broadcast %18 : vector<1x32xf32> to vector<8x32xf32>
    %29 = arith.addf %27, %28 : vector<8x32xf32>
    %c0_28 = arith.constant 0 : index
    %c0_29 = arith.constant 0 : index
    %c0_30 = arith.constant 0 : index
    %30 = vector.load %arg10[%c0_28, %c0_29, %c0_30] : memref<1x8x32xf32, #tpu.memory_space<vmem>>, vector<1x8x32xf32>
    %31 = vector.shape_cast %30 : vector<1x8x32xf32> to vector<8x32xf32>
    %32 = vector.shape_cast %29 : vector<8x32xf32> to vector<1x8x32xf32>
    tpu.vector_store %arg10[%c0_28, %c0_29, %c0_30], %32 {strides = array<i32>} : memref<1x8x32xf32, #tpu.memory_space<vmem>>, vector<1x8x32xf32>,
    return
  }
  func.func @transform_0(%arg0: i32) -> (i32, i32, i32) {
    %c0_i32 = arith.constant 0 : i32
    %c0_i32_0 = arith.constant 0 : i32
    %c0_i32_1 = arith.constant 0 : i32
    return %arg0, %c0_i32, %c0_i32_0 : i32, i32, i32
  }
  func.func @transform_1(%arg0: i32) -> (i32, i32, i32) {
    %c0_i32 = arith.constant 0 : i32
    %c0_i32_0 = arith.constant 0 : i32
    %c0_i32_1 = arith.constant 0 : i32
    return %arg0, %c0_i32, %c0_i32_0 : i32, i32, i32
  }
  func.func @transform_2(%arg0: i32) -> (i32, i32, i32) {
    %c0_i32 = arith.constant 0 : i32
    %c0_i32_0 = arith.constant 0 : i32
    %c0_i32_1 = arith.constant 0 : i32
    return %arg0, %c0_i32, %c0_i32_0 : i32, i32, i32
  }
  func.func @transform_3(%arg0: i32) -> (i32, i32) {
    %c0_i32 = arith.constant 0 : i32
    %c0_i32_0 = arith.constant 0 : i32
    %c0_i32_1 = arith.constant 0 : i32
    return %c0_i32, %c0_i32_0 : i32, i32
  }
  func.func @transform_4(%arg0: i32) -> (i32, i32) {
    %c0_i32 = arith.constant 0 : i32
    %c0_i32_0 = arith.constant 0 : i32
    %c0_i32_1 = arith.constant 0 : i32
    return %c0_i32, %c0_i32_0 : i32, i32
  }
  func.func @transform_5(%arg0: i32) -> (i32, i32) {
    %c0_i32 = arith.constant 0 : i32
    %c0_i32_0 = arith.constant 0 : i32
    %c0_i32_1 = arith.constant 0 : i32
    return %c0_i32, %c0_i32_0 : i32, i32
  }
  func.func @transform_6(%arg0: i32) -> (i32, i32) {
    %c0_i32 = arith.constant 0 : i32
    %c0_i32_0 = arith.constant 0 : i32
    %c0_i32_1 = arith.constant 0 : i32
    return %c0_i32, %c0_i32_0 : i32, i32
  }
  func.func @transform_7(%arg0: i32) -> (i32, i32) {
    %c0_i32 = arith.constant 0 : i32
    %c0_i32_0 = arith.constant 0 : i32
    %c0_i32_1 = arith.constant 0 : i32
    return %c0_i32, %c0_i32_0 : i32, i32
  }
  func.func @transform_8(%arg0: i32) -> (i32, i32) {
    %c0_i32 = arith.constant 0 : i32
    %c0_i32_0 = arith.constant 0 : i32
    %c0_i32_1 = arith.constant 0 : i32
    return %c0_i32, %c0_i32_0 : i32, i32
  }
  func.func @transform_9(%arg0: i32) -> (i32, i32, i32) {
    %c0_i32 = arith.constant 0 : i32
    %c0_i32_0 = arith.constant 0 : i32
    %c0_i32_1 = arith.constant 0 : i32
    return %arg0, %c0_i32, %c0_i32_0 : i32, i32, i32
  }
}

</mosaic_0001>

<bundles_post_ra>
// kernel: tpu_custom_call.1
= control target key start
LH: loop header
LB: loop body
LE: loop exit
PB: predicated region body
PF: predicated region fallthrough
CT: control target
= control target key end

     0   :  { %14 = vsyncpa [#allocation3], 0  ;;  %s1968_s0 = inlined_call_operand.vmem [shape: bf16[1,128,128], index: 0, kind: input, shape index: {}]   ;;  %s1969_s1 = inlined_call_operand.vmem [shape: f32[1,128,16], index: 1, kind: input, shape index: {}]   ;;  %s1970_s2 = inlined_call_operand.hbm [shape: f32[1,8,128], index: 2, kind: input, shape index: {}]   ;;  %s1971_s3 = inlined_call_operand.vmem [shape: f32[16,32], index: 3, kind: input, shape index: {}]   ;;  %s1972_s4 = inlined_call_operand.hbm [shape: f32[16,32], index: 4, kind: input, shape index: {}]   ;;  %s1973_s5 = inlined_call_operand.vmem [shape: f32[1,32], index: 5, kind: input, shape index: {}]   ;;  %s1974_s6 = inlined_call_operand.vmem [shape: f32[32,32], index: 6, kind: input, shape index: {}]   ;;  %s1975_s7 = inlined_call_operand.vmem [shape: f32[32,32], index: 7, kind: input, shape index: {}]   ;;  %s1976_s8 = inlined_call_operand.vmem [shape: f32[1,32], index: 8, kind: input, shape index: {}]   ;;  %s1977_s9 = inlined_call_operand.hbm [shape: f32[1,8,32], index: 9, kind: output, shape index: {}]  }
   0x1   :  { %15 = vsyncpa [#allocation6], 0 }
   0x2   :  { %16 = vsyncpa [#allocation4], 0  ;;  %s1641_s30 = smov [#allocation2]   ;;  %s1642_s11 = smov [#allocation5]  }
   0x3   :  { %s27_s10 = sshll.u32 %s1641_s30, 4  ;;  %s38_s12 = sshll.u32 %s1642_s11, 4  ;;  %s28_s10 = int_to_ptr.vmem [resolvable:$true] %s27_s10  ;;  %s1699_s12 = int_to_ptr.vmem [resolvable:$true] %s38_s12 }
   0x4   :  { %s1569_s15 = scalar_lea.hbm %s1970_s2, 128 }
   0x5   :  { %p1570_p0 = scmp.ne.s32.totalorder %s1970_s2, %s1569_s15  ;;  %p1573_p1 = scmp.lt.u32.totalorder %s1569_s15, %s1970_s2 }
   0x7   :  { %p1575_p2 = pnand %p1573_p1, %p1570_p0 }
   0x9   :  { %1578 = shalt.err (!%p1575_p2)
}
   0xa   :  { %s1579_s20 = scalar_lea.vmem %s28_s10, 128  ;;  %p1584_p4 = scmp.lt.s32.totalorder %s28_s10, %s28_s10 }
   0xb   :  { %p1580_p3 = scmp.ne.s32.totalorder %s28_s10, %s1579_s20  ;;  %p1585_p5 = scmp.lt.s32.totalorder %s1579_s20, %s1579_s20 }
   0xd   :  { %p1586_p6 = por %p1585_p5, %p1584_p4 }
   0xf   :  { %p1587_p7 = pnand %p1586_p6, %p1580_p3 }
  0x11   :  { %1590 = shalt.err (!%p1587_p7)
}
  0x12   :  { %30 = dma.hbm_to_vmem [thread:$0]  %s1970_s2, 128, %s28_s10, [#allocation3]  }
  0x13   :  { %s1591_s25 = scalar_lea.hbm %s1972_s4, 256 }
  0x14   :  { %p1592_p8 = scmp.ne.s32.totalorder %s1972_s4, %s1591_s25  ;;  %p1595_p9 = scmp.lt.u32.totalorder %s1591_s25, %s1972_s4 }
  0x16   :  { %p1597_p10 = pnand %p1595_p9, %p1592_p8 }
  0x18   :  { %1600 = shalt.err (!%p1597_p10)
}
  0x19   :  { %s1601_s30 = scalar_lea.vmem %s1699_s12, 256  ;;  %p1606_p12 = scmp.lt.s32.totalorder %s1699_s12, %s1699_s12 }
  0x1a   :  { %p1602_p11 = scmp.ne.s32.totalorder %s1699_s12, %s1601_s30  ;;  %p1607_p13 = scmp.lt.s32.totalorder %s1601_s30, %s1601_s30 }
  0x1c   :  { %p1608_p0 = por %p1607_p13, %p1606_p12 }
  0x1e   :  { %p1609_p1 = pnand %p1608_p0, %p1602_p11 }
  0x20   :  { %1612 = shalt.err (!%p1609_p1)
}
  0x21   :  { %s1643_s2 = smov 128   ;;  %s1644_s10 = smov 8  }
  0x22   :  { %44 = dma.hbm_to_vmem [thread:$0]  %s1972_s4, 256, %s1699_s12, [#allocation6], %s1643_s2, %s1643_s2, %s1644_s10  }
  0x23   :  { %1635 = dma.done.wait [#allocation3], 128  }
  0x24   :  { %1636 = vsyncadd [#allocation3], 4294967168 }
  0x25   :  { %1637 = dma.done.wait [#allocation6], 256  }
  0x26   :  { %1638 = vsyncadd [#allocation6], 4294967040  ;;  %vm250_vm0 = vcmask 130048   ;;  %v76_v0 = vld [vmem:[%s1969_s1] sm:$0xff]  ;;  %v77_v1 = vld [vmem:[%s1969_s1 + $0x8] sm:$0xff]  ;;  %v1645_v54 = vmov 0.0|0.0  }
  0x27   :  { %v78_v2 = vld [vmem:[%s1969_s1 + $0x10] sm:$0xff]  ;;  %v97_v3 = vpack.c.bf16 %v77_v1, %v76_v0  ;;  %v79_v4 = vld [vmem:[%s1969_s1 + $0x18] sm:$0xff]  ;;  %1293 = vmatprep.mubr.msk.f32.mxu1 %vm250_vm0, %v76_v0  ;;  %v80_v6 = vld [vmem:[%s1969_s1 + $0x20] sm:$0xff]  ;;  %vm1646_vm1 = vmmov 0   ;;  %vm930_vm2 = vcmask 261120   ;;  %s1648_s30 = smov [#allocation7]  }
  0x28   :  { %v98_v5 = vpack.c.bf16 %v79_v4, %v78_v2  ;;  %v81_v7 = vld [vmem:[%s1969_s1 + $0x28] sm:$0xff]  ;;  %v82_v8 = vld [vmem:[%s1969_s1 + $0x30] sm:$0xff]  ;;  %v83_v10 = vld [vmem:[%s1969_s1 + $0x38] sm:$0xff]  ;;  %s1091_s2 = sshll.u32 %s1648_s30, 4  ;;  %s1092_s2 = int_to_ptr.vmem [resolvable:$true] %s1091_s2 }
  0x29   :  { %1257 = vmatprep.subr.bf16.mxu0 %v97_v3  ;;  %v99_v9 = vpack.c.bf16 %v81_v7, %v80_v6  ;;  %v1758_v11 = vld [vmem:[%s1968_s0] sm:$0xff]   ;;  %v100_v12 = vpack.c.bf16 %v83_v10, %v82_v8  ;;  %v85_v14 = vld [vmem:[%s1969_s1 + $0x48] sm:$0xff]  ;;  %v86_v16 = vld [vmem:[%s1969_s1 + $0x50] sm:$0xff]  ;;  %s1613_s10 = scalar_lea.vmem %s1092_s2, 128  ;;  %p1618_p3 = scmp.lt.s32.totalorder %s1092_s2, %s1092_s2 }
  0x2a   :  { %1258 = vmatpush3.bf16.msra.mxu0 %v97_v3  ;;  %1273 = vmatprep.mubr.bf16.mxu0 %v1758_v11  ;;  %v84_v13 = vld [vmem:[%s1969_s1 + $0x40] sm:$0xff]  ;;  %v94_v17 = vld [vmem:[#allocation5] sm:$0xff]  ;;  %v95_v18 = vld [vmem:[#allocation5 + $0x8] sm:$0xff]  ;;  %p1614_p2 = scmp.ne.s32.totalorder %s1092_s2, %s1613_s10  ;;  %p1619_p4 = scmp.lt.s32.totalorder %s1613_s10, %s1613_s10 }
  0x2b   :  { %1259 = vmatprep.subr.bf16.mxu0 %v98_v5  ;;  %v101_v15 = vpack.c.bf16 %v85_v14, %v84_v13  ;;  %v87_v19 = vld [vmem:[%s1969_s1 + $0x58] sm:$0xff]  ;;  %v1469_v20 = vpack.c.bf16 %v95_v18, %v94_v17  ;;  %v92_v21 = vld [vmem:[%s1971_s3] sm:$0xff]  ;;  %v93_v22 = vld [vmem:[%s1971_s3 + $0x8] sm:$0xff] }
  0x2c   :  { %v1473_v23 = vpack.c.bf16 %v93_v22, %v92_v21  ;;  %v102_v24 = vpack.c.bf16 %v87_v19, %v86_v16  ;;  %v88_v25 = vld [vmem:[%s1969_s1 + $0x60] sm:$0xff]  ;;  %v89_v26 = vld [vmem:[%s1969_s1 + $0x68] sm:$0xff]  ;;  %v90_v28 = vld [vmem:[%s1969_s1 + $0x70] sm:$0xff]  ;;  %p1620_p5 = por %p1619_p4, %p1618_p3 }
  0x2d   :  { %1470 = vmatprep.subr.bf16.mxu1 %v1469_v20  ;;  %v103_v27 = vpack.c.bf16 %v89_v26, %v88_v25  ;;  %v91_v29 = vld [vmem:[%s1969_s1 + $0x78] sm:$0xff]  ;;  %v1800_v31 = vld [vmem:[%s1968_s0 + $0x8] sm:$0xff]   ;;  %v1805_v32 = vld [vmem:[%s1968_s0 + $0x10] sm:$0xff]  }
  0x2e   :  { %1260 = vmatpush3.bf16.msra.mxu0 %v98_v5  ;;  %1472 = vmatpush3.bf16.msra.mxu1 %v1469_v20  ;;  %v104_v30 = vpack.c.bf16 %v91_v29, %v90_v28  ;;  %v1816_v33 = vld [vmem:[%s1968_s0 + $0x18] sm:$0xff]   ;;  %v1821_v34 = vld [vmem:[%s1968_s0 + $0x20] sm:$0xff]   ;;  %v1832_v35 = vld [vmem:[%s1968_s0 + $0x28] sm:$0xff]   ;;  %p1621_p6 = pnand %p1620_p5, %p1614_p2 }
  0x2f   :  { %1261 = vmatprep.subr.bf16.mxu0 %v99_v9  ;;  %1474 = vmatprep.subr.bf16.mxu1 %v1473_v23  ;;  %v1837_v36 = vld [vmem:[%s1968_s0 + $0x30] sm:$0xff]   ;;  %v1845_v37 = vld [vmem:[%s1968_s0 + $0x38] sm:$0xff]   ;;  %v1869_v55 = vld [vmem:[%s1973_s5] ss:$0 sm:$0xff] }
  0x31   :  { %1294 = vmatmul.mubr.msk.f32.vlgmr.msra.gmra.mrb[0].mxu1 %vm250_vm0, %v77_v1 }
  0x32   :  { %1262 = vmatpush3.bf16.msra.mxu0 %v99_v9  ;;  %1476 = vmatpush3.bf16.msra.mxu1 %v1473_v23 }
  0x33   :  { %1263 = vmatprep.subr.bf16.mxu0 %v100_v12  ;;  %1296 = vmatprep.mubr.msk.f32.mxu1 %vm250_vm0, %v78_v2 }
  0x34   :  { %1477 = vmatprep.subr.bf16.mxu1 %v1645_v54 }
  0x35   :  { %1297 = vmatmul.mubr.msk.f32.gmra.mrb[2].mxu1 %vm250_vm0, %v79_v4 }
  0x36   :  { %1264 = vmatpush3.bf16.msra.mxu0 %v100_v12  ;;  %1299 = vmatprep.mubr.msk.f32.mxu1 %vm250_vm0, %v80_v6 }
  0x37   :  { %1265 = vmatprep.subr.bf16.mxu0 %v101_v15 }
  0x39   :  { %1300 = vmatmul.mubr.msk.f32.gmra.mrb[4].mxu1 %vm250_vm0, %v81_v7 }
  0x3a   :  { %1266 = vmatpush3.bf16.msra.mxu0 %v101_v15  ;;  %1302 = vmatprep.mubr.msk.f32.mxu1 %vm250_vm0, %v82_v8 }
  0x3b   :  { %1267 = vmatprep.subr.bf16.mxu0 %v102_v24 }
  0x3d   :  { %1303 = vmatmul.mubr.msk.f32.gmra.mrb[6].mxu1 %vm250_vm0, %v83_v10 }
  0x3e   :  { %1268 = vmatpush3.bf16.msra.mxu0 %v102_v24  ;;  %1305 = vmatprep.mubr.msk.f32.mxu1 %vm250_vm0, %v84_v13 }
  0x3f   :  { %1269 = vmatprep.subr.bf16.mxu0 %v103_v27 }
  0x41   :  { %1306 = vmatmul.mubr.msk.f32.gmra.mrb[8].mxu1 %vm250_vm0, %v85_v14 }
  0x42   :  { %1270 = vmatpush3.bf16.msra.mxu0 %v103_v27  ;;  %1308 = vmatprep.mubr.msk.f32.mxu1 %vm250_vm0, %v86_v16 }
  0x43   :  { %1271 = vmatprep.subr.bf16.mxu0 %v104_v30 }
  0x45   :  { %1309 = vmatmul.mubr.msk.f32.gmra.mrb[10].mxu1 %vm250_vm0, %v87_v19 }
  0x46   :  { %1272 = vmatpush3.bf16.msra.mxu0 %v104_v30  ;;  %1311 = vmatprep.mubr.msk.f32.mxu1 %vm250_vm0, %v88_v25 }
  0x49   :  { %1274 = vmatmul.mubr.bf16.vlgmr.msra.gmra.mrb[0].mxu0 %v1800_v31  ;;  %1312 = vmatmul.mubr.msk.f32.gmra.mrb[12].mxu1 %vm250_vm0, %v89_v26 }
  0x4a   :  { %1277 = vmatprep.mubr.bf16.mxu0 %v1805_v32  ;;  %1314 = vmatprep.mubr.msk.f32.mxu1 %vm250_vm0, %v90_v28 }
  0x4d   :  { %1315 = vmatmul.mubr.msk.f32.gmra.mrb[14].mxu1 %vm250_vm0, %v91_v29 }
  0x51   :  { %1278 = vmatmul.mubr.bf16.gmra.mrb[4].mxu0 %v1816_v33 }
  0x52   :  { %1281 = vmatprep.mubr.bf16.mxu0 %v1821_v34 }
  0x59   :  { %1282 = vmatmul.mubr.bf16.gmra.mrb[8].mxu0 %v1832_v35 }
  0x5a   :  { %1285 = vmatprep.mubr.bf16.mxu0 %v1837_v36 }
  0x61   :  { %1286 = vmatmul.mubr.bf16.gmra.mrb[12].mxu0 %v1845_v37 }
  0x62   :  { %1361 = vmatprep.mubr.bf16.mxu0 %v1758_v11 }
 0x11c   :  { %v1275_v38 = vpop.f32.mrb[0].mxu0 }
 0x11d   :  { %v187_v39 = vpop.f32.mrb[1].mxu0 }
 0x11e   :  { %v1276_v40 = vpop.f32.mrb[2].mxu0  ;;  %1321 = vmatprep.mubr.msk.f32.mxu1 %vm250_vm0, %v187_v39 }
 0x11f   :  { %v190_v41 = vpop.f32.mrb[3].mxu0 }
 0x120   :  { %1322 = vmatmul.mubr.msk.f32.vlgmr.msra.gmra.mrb[0].mxu1 %vm250_vm0, %v190_v41 }
 0x121   :  { %1324 = vmatprep.mubr.msk.f32.mxu1 %vm250_vm0, %v1275_v38 }
 0x124   :  { %v1279_v42 = vpop.f32.mrb[4].mxu0  ;;  %1325 = vmatmul.mubr.msk.f32.gmra.mrb[2].mxu1 %vm250_vm0, %v1276_v40 }
 0x125   :  { %v203_v43 = vpop.f32.mrb[5].mxu0 }
 0x126   :  { %v1280_v44 = vpop.f32.mrb[6].mxu0  ;;  %1327 = vmatprep.mubr.msk.f32.mxu1 %vm250_vm0, %v203_v43 }
 0x127   :  { %v206_v45 = vpop.f32.mrb[7].mxu0 }
 0x128   :  { %1328 = vmatmul.mubr.msk.f32.gmra.mrb[4].mxu1 %vm250_vm0, %v206_v45 }
 0x129   :  { %1330 = vmatprep.mubr.msk.f32.mxu1 %vm250_vm0, %v1279_v42 }
 0x12c   :  { %v1283_v46 = vpop.f32.mrb[8].mxu0  ;;  %1331 = vmatmul.mubr.msk.f32.gmra.mrb[6].mxu1 %vm250_vm0, %v1280_v44 }
 0x12d   :  { %v219_v47 = vpop.f32.mrb[9].mxu0 }
 0x12e   :  { %v1284_v48 = vpop.f32.mrb[10].mxu0  ;;  %1333 = vmatprep.mubr.msk.f32.mxu1 %vm250_vm0, %v219_v47 }
 0x12f   :  { %v222_v49 = vpop.f32.mrb[11].mxu0 }
 0x130   :  { %1334 = vmatmul.mubr.msk.f32.gmra.mrb[8].mxu1 %vm250_vm0, %v222_v49 }
 0x131   :  { %1336 = vmatprep.mubr.msk.f32.mxu1 %vm250_vm0, %v1283_v46 }
 0x134   :  { %v1287_v50 = vpop.f32.mrb[12].mxu0  ;;  %1337 = vmatmul.mubr.msk.f32.gmra.mrb[10].mxu1 %vm250_vm0, %v1284_v48 }
 0x135   :  { %v235_v51 = vpop.f32.mrb[13].mxu0 }
 0x136   :  { %v1288_v52 = vpop.f32.mrb[14].mxu0  ;;  %1339 = vmatprep.mubr.msk.f32.mxu1 %vm250_vm0, %v235_v51 }
 0x137   :  { %v238_v53 = vpop.f32.mrb[15].mxu0 }
 0x138   :  { %1340 = vmatmul.mubr.msk.f32.gmra.mrb[12].mxu1 %vm250_vm0, %v238_v53 }
 0x139   :  { %1342 = vmatprep.mubr.msk.f32.mxu1 %vm250_vm0, %v1287_v50 }
 0x13c   :  { %1343 = vmatmul.mubr.msk.f32.gmra.mrb[14].mxu1 %vm250_vm0, %v1288_v52 }
 0x1f3   :  { %v1323_v56 = vpop.f32.mrb[0].mxu1 }
 0x1f4   :  { %v644_v57 = vadd.f32 %v1323_v56, %v1869_v55  ;;  %v558_v58 = vpop.f32.mrb[1].mxu1 }
 0x1f5   :  { %v643_v59 = vadd.f32 %v1869_v55, %v558_v58 }
 0x1f6   :  { %v660_v60 = vmax.f32 %v644_v57, 0.0 }
 0x1f7   :  { %v659_v61 = vmax.f32 %v643_v59, 0.0  ;;  %v1326_v62 = vpop.f32.mrb[2].mxu1 }
 0x1f8   :  { %v646_v63 = vadd.f32 %v1326_v62, %v1869_v55  ;;  %v568_v0 = vpop.f32.mrb[3].mxu1 }
 0x1f9   :  { %v1874_v1 = vpack.c.bf16 %v660_v60, %v659_v61  ;;  %v645_v2 = vadd.f32 %v1869_v55, %v568_v0 }
 0x1fa   :  { %v662_v3 = vmax.f32 %v646_v63, 0.0 }
 0x1fb   :  { %v661_v4 = vmax.f32 %v645_v2, 0.0  ;;  %v1329_v5 = vpop.f32.mrb[4].mxu1  ;;  %1345 = vmatprep.subr.bf16.mxu0 %v1874_v1 }
 0x1fc   :  { %v648_v6 = vadd.f32 %v1329_v5, %v1869_v55  ;;  %v578_v7 = vpop.f32.mrb[5].mxu1  ;;  %1346 = vmatpush3.bf16.msra.mxu0 %v1874_v1 }
 0x1fd   :  { %v685_v8 = vpack.c.bf16 %v662_v3, %v661_v4  ;;  %v647_v9 = vadd.f32 %v1869_v55, %v578_v7 }
 0x1fe   :  { %v664_v10 = vmax.f32 %v648_v6, 0.0 }
 0x1ff   :  { %v663_v11 = vmax.f32 %v647_v9, 0.0  ;;  %v1332_v12 = vpop.f32.mrb[6].mxu1  ;;  %1347 = vmatprep.subr.bf16.mxu0 %v685_v8 }
 0x200   :  { %v650_v13 = vadd.f32 %v1332_v12, %v1869_v55  ;;  %v588_v14 = vpop.f32.mrb[7].mxu1  ;;  %1348 = vmatpush3.bf16.msra.mxu0 %v685_v8  ;;  %v680_v12 = vld [vmem:[%s1975_s7 + $0x8] sm:$0xff] }
 0x201   :  { %v686_v15 = vpack.c.bf16 %v664_v10, %v663_v11  ;;  %v649_v16 = vadd.f32 %v1869_v55, %v588_v14  ;;  %v679_v11 = vld [vmem:[%s1975_s7] sm:$0xff]  ;;  %v681_v14 = vld [vmem:[%s1975_s7 + $0x10] sm:$0xff] }
 0x202   :  { %v666_v17 = vmax.f32 %v650_v13, 0.0  ;;  %v1526_v13 = vpack.c.bf16 %v680_v12, %v679_v11 }
 0x203   :  { %v665_v18 = vmax.f32 %v649_v16, 0.0  ;;  %v1335_v19 = vpop.f32.mrb[8].mxu1  ;;  %1349 = vmatprep.subr.bf16.mxu0 %v686_v15 }
 0x204   :  { %v652_v20 = vadd.f32 %v1335_v19, %v1869_v55  ;;  %v598_v21 = vpop.f32.mrb[9].mxu1  ;;  %1350 = vmatpush3.bf16.msra.mxu0 %v686_v15 }
 0x205   :  { %v687_v22 = vpack.c.bf16 %v666_v17, %v665_v18  ;;  %v651_v23 = vadd.f32 %v1869_v55, %v598_v21  ;;  %v675_v17 = vld [vmem:[%s1974_s6] sm:$0xff]  ;;  %v676_v18 = vld [vmem:[%s1974_s6 + $0x8] sm:$0xff]  ;;  %v678_v21 = vld [vmem:[%s1974_s6 + $0x18] sm:$0xff] }
 0x206   :  { %v668_v24 = vmax.f32 %v652_v20, 0.0  ;;  %v1532_v19 = vpack.c.bf16 %v676_v18, %v675_v17  ;;  %v677_v20 = vld [vmem:[%s1974_s6 + $0x10] sm:$0xff] }
 0x207   :  { %v667_v25 = vmax.f32 %v651_v23, 0.0  ;;  %v1338_v26 = vpop.f32.mrb[10].mxu1  ;;  %1351 = vmatprep.subr.bf16.mxu0 %v687_v22 }
 0x208   :  { %v654_v27 = vadd.f32 %v1338_v26, %v1869_v55  ;;  %v608_v28 = vpop.f32.mrb[11].mxu1  ;;  %1352 = vmatpush3.bf16.msra.mxu0 %v687_v22 }
 0x209   :  { %v688_v29 = vpack.c.bf16 %v668_v24, %v667_v25  ;;  %v653_v30 = vadd.f32 %v1869_v55, %v608_v28  ;;  %v1535_v24 = vpack.c.bf16 %v678_v21, %v677_v20 }
 0x20a   :  { %v670_v38 = vmax.f32 %v654_v27, 0.0 }
 0x20b   :  { %v669_v39 = vmax.f32 %v653_v30, 0.0  ;;  %v1341_v40 = vpop.f32.mrb[12].mxu1  ;;  %1353 = vmatprep.subr.bf16.mxu0 %v688_v29 }
 0x20c   :  { %v656_v41 = vadd.f32 %v1341_v40, %v1869_v55  ;;  %v618_v42 = vpop.f32.mrb[13].mxu1  ;;  %1354 = vmatpush3.bf16.msra.mxu0 %v688_v29 }
 0x20d   :  { %v689_v43 = vpack.c.bf16 %v670_v38, %v669_v39  ;;  %v655_v44 = vadd.f32 %v1869_v55, %v618_v42 }
 0x20e   :  { %v672_v45 = vmax.f32 %v656_v41, 0.0 }
 0x20f   :  { %v671_v46 = vmax.f32 %v655_v44, 0.0  ;;  %v1344_v47 = vpop.f32.mrb[14].mxu1  ;;  %1355 = vmatprep.subr.bf16.mxu0 %v689_v43 }
 0x210   :  { %v658_v48 = vadd.f32 %v1344_v47, %v1869_v55  ;;  %v628_v49 = vpop.f32.mrb[15].mxu1  ;;  %1356 = vmatpush3.bf16.msra.mxu0 %v689_v43 }
 0x211   :  { %v690_v50 = vpack.c.bf16 %v672_v45, %v671_v46  ;;  %v657_v51 = vadd.f32 %v1869_v55, %v628_v49 }
 0x212   :  { %v674_v52 = vmax.f32 %v658_v48, 0.0 }
 0x213   :  { %v673_v53 = vmax.f32 %v657_v51, 0.0  ;;  %1357 = vmatprep.subr.bf16.mxu0 %v690_v50 }
 0x214   :  { %1358 = vmatpush3.bf16.msra.mxu0 %v690_v50 }
 0x215   :  { %v691_v56 = vpack.c.bf16 %v674_v52, %v673_v53 }
 0x217   :  { %1359 = vmatprep.subr.bf16.mxu0 %v691_v56 }
 0x218   :  { %1360 = vmatpush3.bf16.msra.mxu0 %v691_v56 }
 0x219   :  { %1501 = vmatprep.subr.bf16.mxu0 %v1645_v54 }
 0x21b   :  { %1362 = vmatmul.mubr.bf16.vlgmr.msra.gmra.mrb[16].mxu0 %v1800_v31  ;;  %v1647_v31 = vmov 0.0  }
 0x21c   :  { %1503 = vmatpush3.bf16.msra.mxu0 %v1874_v1  ;;  %1365 = vmatprep.mubr.bf16.mxu0 %v1805_v32  ;;  %v789_v32 = vld [vmem:[#allocation2] sm:$0xff] }
 0x21d   :  { %1504 = vmatprep.subr.bf16.mxu0 %v1645_v54  ;;  %1409 = vmatprep.mubr.msk.f32.mxu1 %vm1646_vm1, %v1647_v31 }
 0x220   :  { %1506 = vmatpush3.bf16.msra.mxu0 %v685_v8 }
 0x221   :  { %1507 = vmatprep.subr.bf16.mxu0 %v1645_v54 }
 0x223   :  { %1366 = vmatmul.mubr.bf16.gmra.mrb[20].mxu0 %v1816_v33 }
 0x224   :  { %1509 = vmatpush3.bf16.msra.mxu0 %v686_v15  ;;  %1369 = vmatprep.mubr.bf16.mxu0 %v1821_v34  ;;  %v682_v15 = vld [vmem:[%s1975_s7 + $0x18] sm:$0xff] }
 0x225   :  { %1510 = vmatprep.subr.bf16.mxu0 %v1645_v54  ;;  %v1529_v16 = vpack.c.bf16 %v682_v15, %v681_v14 }
 0x228   :  { %1512 = vmatpush3.bf16.msra.mxu0 %v687_v22 }
 0x229   :  { %1513 = vmatprep.subr.bf16.mxu0 %v1645_v54 }
 0x22b   :  { %1370 = vmatmul.mubr.bf16.gmra.mrb[24].mxu0 %v1832_v35 }
 0x22c   :  { %1515 = vmatpush3.bf16.msra.mxu0 %v688_v29  ;;  %1373 = vmatprep.mubr.bf16.mxu0 %v1837_v36  ;;  %v1144_v29 = vld [vmem:[%s1976_s8] ss:$0 sm:$0xff] }
 0x22d   :  { %1516 = vmatprep.subr.bf16.mxu0 %v1645_v54 }
 0x230   :  { %1518 = vmatpush3.bf16.msra.mxu0 %v689_v43 }
 0x231   :  { %1519 = vmatprep.subr.bf16.mxu0 %v1645_v54 }
 0x233   :  { %1374 = vmatmul.mubr.bf16.gmra.mrb[28].mxu0 %v1845_v37 }
 0x234   :  { %1521 = vmatpush3.bf16.msra.mxu0 %v690_v50  ;;  %1444 = vmatprep.mubr.msk.f32.mxu0 %vm1646_vm1, %v1647_v31 }
 0x235   :  { %1522 = vmatprep.subr.bf16.mxu0 %v1645_v54 }
 0x238   :  { %1524 = vmatpush3.bf16.msra.mxu0 %v691_v56 }
 0x23b   :  { %1445 = vmatmul.mubr.f32.vlgmr.msra.gmra.mrb[32].mxu0 %v789_v32 }
 0x2ee   :  { %v1363_v33 = vpop.f32.mrb[16].mxu0 }
 0x2ef   :  { %v726_v34 = vpop.f32.mrb[17].mxu0 }
 0x2f0   :  { %v1364_v35 = vpop.f32.mrb[18].mxu0 }
 0x2f1   :  { %v1481_v36 = vpack.c.bf16 %v1364_v35, %v1363_v33  ;;  %v729_v55 = vpop.f32.mrb[19].mxu0 }
 0x2f2   :  { %v1478_v37 = vpack.c.bf16 %v729_v55, %v726_v34 }
 0x2f4   :  { %1479 = vmatpush3.bf16.msra.mxu1 %v1478_v37 }
 0x2f5   :  { %1480 = vmatprep.subr.bf16.mxu1 %v1645_v54 }
 0x2f6   :  { %v1367_v57 = vpop.f32.mrb[20].mxu0 }
 0x2f7   :  { %v742_v58 = vpop.f32.mrb[21].mxu0 }
 0x2f8   :  { %v1368_v59 = vpop.f32.mrb[22].mxu0  ;;  %1482 = vmatpush3.bf16.msra.mxu1 %v1481_v36 }
 0x2f9   :  { %v1487_v60 = vpack.c.bf16 %v1368_v59, %v1367_v57  ;;  %v745_v61 = vpop.f32.mrb[23].mxu0  ;;  %1483 = vmatprep.subr.bf16.mxu1 %v1645_v54 }
 0x2fa   :  { %v1484_v62 = vpack.c.bf16 %v745_v61, %v742_v58 }
 0x2fc   :  { %1485 = vmatpush3.bf16.msra.mxu1 %v1484_v62 }
 0x2fd   :  { %1486 = vmatprep.subr.bf16.mxu1 %v1645_v54 }
 0x2fe   :  { %v1371_v63 = vpop.f32.mrb[24].mxu0 }
 0x2ff   :  { %v758_v0 = vpop.f32.mrb[25].mxu0 }
 0x300   :  { %v1372_v1 = vpop.f32.mrb[26].mxu0  ;;  %1488 = vmatpush3.bf16.msra.mxu1 %v1487_v60 }
 0x301   :  { %v1493_v2 = vpack.c.bf16 %v1372_v1, %v1371_v63  ;;  %v761_v3 = vpop.f32.mrb[27].mxu0  ;;  %1489 = vmatprep.subr.bf16.mxu1 %v1645_v54 }
 0x302   :  { %v1490_v4 = vpack.c.bf16 %v761_v3, %v758_v0 }
 0x304   :  { %1491 = vmatpush3.bf16.msra.mxu1 %v1490_v4 }
 0x305   :  { %1492 = vmatprep.subr.bf16.mxu1 %v1645_v54 }
 0x306   :  { %v1375_v5 = vpop.f32.mrb[28].mxu0 }
 0x307   :  { %v774_v6 = vpop.f32.mrb[29].mxu0 }
 0x308   :  { %v1376_v7 = vpop.f32.mrb[30].mxu0  ;;  %1494 = vmatpush3.bf16.msra.mxu1 %v1493_v2 }
 0x309   :  { %v1499_v8 = vpack.c.bf16 %v1376_v7, %v1375_v5  ;;  %v777_v9 = vpop.f32.mrb[31].mxu0  ;;  %1495 = vmatprep.subr.bf16.mxu1 %v1645_v54 }
 0x30a   :  { %v1496_v10 = vpack.c.bf16 %v777_v9, %v774_v6 }
 0x30c   :  { %1497 = vmatpush3.bf16.msra.mxu1 %v1496_v10 }
 0x30d   :  { %1498 = vmatprep.subr.bf16.mxu1 %v1645_v54 }
 0x30e   :  { %v926_v22 = vpop.f32.mrb[32].mxu0 }
 0x30f   :  { %v1446_v23 = vpop.f32.mrb[33].mxu0 }
 0x310   :  { %1500 = vmatpush3.bf16.msra.mxu1 %v1499_v8 }
 0x311   :  { %1525 = vmatprep.subr.bf16.mxu1 %v1645_v54 }
 0x313   :  { %1410 = vmatmul.mubr.f32.vlgmr.msra.gmra.mrb[16].mxu1 %v789_v32 }
 0x314   :  { %1527 = vmatpush3.bf16.msra.mxu1 %v1526_v13  ;;  %1455 = vmatprep.mubr.msk.f32.mxu1 %vm1646_vm1, %v1647_v31 }
 0x315   :  { %1528 = vmatprep.subr.bf16.mxu1 %v1645_v54 }
 0x318   :  { %1530 = vmatpush3.bf16.msra.mxu1 %v1529_v16 }
 0x319   :  { %1531 = vmatprep.subr.bf16.mxu1 %v1645_v54 }
 0x31b   :  { %1456 = vmatmul.mubr.msk.f32.vlgmr.msra.gmra.mrb[18].mxu1 %vm930_vm2, %v926_v22 }
 0x31c   :  { %1533 = vmatpush3.bf16.msra.mxu1 %v1532_v19  ;;  %1466 = vmatprep.mubr.msk.f32.mxu1 %vm1646_vm1, %v1647_v31 }
 0x31d   :  { %1534 = vmatprep.subr.bf16.mxu1 %v1645_v54 }
 0x320   :  { %1536 = vmatpush3.bf16.msra.mxu1 %v1535_v24 }
 0x3e6   :  { %v856_v25 = vpop.f32.mrb[16].mxu1 }
 0x3e7   :  { %v1411_v26 = vpop.f32.mrb[17].mxu1  ;;  %1467 = vmatmul.mubr.msk.f32.vlgmr.msra.gmra.mrb[20].mxu1 %vm930_vm2, %v856_v25 }
 0x3ee   :  { %v1000_v27 = vpop.f32.mrb[18].mxu1 }
 0x3ef   :  { %v1457_v28 = vpop.f32.mrb[19].mxu1 }
 0x4ba   :  { %v1073_v30 = vpop.f32.mrb[20].mxu1 }
 0x4bb   :  { %v1074_v38 = vadd.f32 %v1073_v30, %v1000_v27  ;;  %v1468_v39 = vpop.f32.mrb[21].mxu1 }
 0x4bd   :  { %v1083_v40 = vadd.f32 %v1144_v29, %v1074_v38 }
 0x4bf   :  { %1084 = vst.msk [vmem:[#allocation7] sm:$0xff] %vm930_vm2, %v1083_v40 }
 0x4c0   :  { %1624 = shalt.err (!%p1621_p6)
}
 0x4c1   :  { %s1625_s8 = scalar_lea.hbm %s1977_s9, 128 }
 0x4c2   :  { %p1626_p7 = scmp.ne.s32.totalorder %s1977_s9, %s1625_s8  ;;  %p1629_p8 = scmp.lt.u32.totalorder %s1625_s8, %s1977_s9 }
 0x4c4   :  { %p1631_p9 = pnand %p1629_p8, %p1626_p7 }
 0x4c6   :  { %1634 = shalt.err (!%p1631_p9)
}
 0x4c7   :  { %1094 = dma.vmem_to_hbm [thread:$0]  %s1092_s2, 128, %s1977_s9, [#allocation4]  }
 0x4c8   :  { %1639 = dma.done.wait [#allocation4], 128  }
 0x4c9   :  { %1640 = vsyncadd [#allocation4], 4294967168 }
 0x4ca   :  { %1098 = vsyncpa [#allocation3], 1 }
 0x4cb   :  { %1099 = vsyncpa [#allocation6], 1 }
 0x4cc   :  { %1100 = vsyncpa [#allocation4], 1 }

</bundles_post_ra>
